<compile_context>
chip_gen: v7x
topology: tpu7x:2x2x1
jax: 0.10.0
libtpu: 0.0.40
codegen_flags: <defaults>
</compile_context>

<pallas_src>
import functools

import jax
import jax.numpy as jnp
from jax.experimental import pallas as pl
from jax.experimental.pallas import tpu as pltpu


def _row_argmax(x):
    """argmax over the lane (label) axis, first occurrence on ties. Returns (rows, 1) i32."""
    labels = x.shape[-1]
    mx = jnp.max(x, axis=-1, keepdims=True)
    lane = jax.lax.broadcasted_iota(jnp.int32, x.shape, 1)
    idx = jnp.min(jnp.where(x == mx, lane, jnp.int32(labels)), axis=-1, keepdims=True)
    # A row whose max is NaN matches nothing (idx == labels); clamp so the host-side
    # label lookup stays in range.  (torch.argmax would return the NaN position.)
    return jnp.minimum(idx, jnp.int32(labels - 1))


def _ctc_decode_kernel(em_ref, bnd_ref, out_ref, *, blank: int):
    em = em_ref[...]                                     # (tile_t, L)
    tile_t = em.shape[0]

    idx = _row_argmax(em)                                # (tile_t, 1) int32

    # Previous time-step index: sublane-rotate within the tile (XLU slot, off the VALU
    # critical path); local row 0 is patched with the argmax of the last row of the
    # *previous* tile (bnd_ref holds the rows immediately preceding this tile).
    prev = pltpu.roll(idx, shift=1, axis=0)
    prev_tile_last = _row_argmax(bnd_ref[...])[-1:, :]   # (1, 1)
    row = jax.lax.broadcasted_iota(jnp.int32, (tile_t, 1), 0)
    prev = jnp.where(row == 0, prev_tile_last, prev)

    first_global_row = (pl.program_id(0) == 0) & (row == 0)
    keep = (idx != jnp.int32(blank)) & (first_global_row | (idx != prev))

    # Merged output: kept label index, or -1 for dropped steps.  The (tile_t, 1)
    # store is lane-narrow, but output HBM traffic is only ~1/L of the input traffic
    # and a column output avoids a risky in-kernel sublane->lane relayout; the big
    # levers (large pipelined T-tiles, single merged output, parallel semantics) are
    # applied above.
    out_ref[...] = jnp.where(keep, idx, jnp.int32(-1))


def _sublane_granule(itemsize: int) -> int:
    """Minimal legal second-minor tile: 8 rows (4-byte), 16 (2-byte), 32 (1-byte)."""
    return max(8, 32 // int(itemsize))


def _pick_tile_t(num_seq, num_label, itemsize, max_tile=8192,
                 vmem_budget_bytes=24 * 1024 * 1024):
    """Biggest T-tile that keeps the entire double-buffered pipeline (input tile +
    int32 output tile, both lane-padded to 128 in VMEM) well under the 32 MiB scoped
    VMEM limit on every generation (v7x has only 64 MiB physical VMEM)."""
    granule = _sublane_granule(itemsize)
    lane_in = pl.cdiv(max(num_label, 1), 128) * 128      # VMEM lane padding
    bytes_per_row = 2 * lane_in * itemsize + 2 * 128 * 4  # 2x input buf + 2x output buf
    rows_by_vmem = max(granule,
                       (vmem_budget_bytes // bytes_per_row) // granule * granule)
    rows_needed = pl.cdiv(max(num_seq, 1), granule) * granule
    return int(max(granule, min(max_tile, rows_by_vmem, rows_needed)))


def _ctc_decode_pallas(emission, *, blank: int, tile_t=None):
    """Pallas kernel wrapper: returns merged int32[T] (label index or -1 if dropped)."""
    num_seq, num_label = emission.shape
    itemsize = emission.dtype.itemsize
    granule = _sublane_granule(itemsize)
    if tile_t is None:
        tile_t = _pick_tile_t(num_seq, num_label, itemsize)
    tile_t = max(granule, (int(tile_t) // granule) * granule)

    num_tiles = pl.cdiv(num_seq, tile_t)
    padded_t = num_tiles * tile_t
    if padded_t != num_seq:
        emission = jnp.pad(emission, ((0, padded_t - num_seq), (0, 0)))

    bnd_blocks_per_tile = tile_t // granule   # scale for the boundary block index

    grid_spec = pltpu.PrefetchScalarGridSpec(
        num_scalar_prefetch=0,
        grid=(num_tiles,),
        in_specs=[
            # Main emission tile (auto double-buffered HBM->VMEM pipeline).
            pl.BlockSpec((tile_t, num_label), lambda i: (i, 0)),
            # The `granule` rows immediately preceding this tile (clamped for tile 0,
            # whose value is ignored thanks to the program_id(0)==0 guard in-kernel).
            pl.BlockSpec((granule, num_label),
                         lambda i: (jnp.maximum(i * bnd_blocks_per_tile - 1, 0), 0)),
        ],
        out_specs=pl.BlockSpec((tile_t, 1), lambda i: (i, 0)),
    )

    cost = pl.CostEstimate(
        flops=int(6 * padded_t * num_label),
        transcendentals=0,
        bytes_accessed=int(padded_t * num_label * itemsize
                           + num_tiles * granule * num_label * itemsize
                           + padded_t * 4),
    )

    merged = pl.pallas_call(
        functools.partial(_ctc_decode_kernel, blank=blank),
        out_shape=jax.ShapeDtypeStruct((padded_t, 1), jnp.int32),
        grid_spec=grid_spec,
        compiler_params=pltpu.CompilerParams(
            dimension_semantics=("parallel",),    # v7x: shard tiles across both TCs
            vmem_limit_bytes=32 * 1024 * 1024,    # explicit, fits every generation
        ),
        cost_estimate=cost,
    )(emission, emission)

    return merged[:num_seq, 0]


def _compact(merged):
    """Device-side compaction of kept indices into a dense prefix (plain XLA ops)."""
    valid = merged >= 0
    count = jnp.sum(valid.astype(jnp.int32))
    pos = jnp.cumsum(valid.astype(jnp.int32)) - 1
    dest = jnp.where(valid, pos, merged.shape[0])          # invalid -> OOB, dropped
    compact = jnp.full(merged.shape, -1, jnp.int32).at[dest].set(merged, mode="drop")
    return compact, count


@functools.partial(jax.jit, static_argnames=("blank", "tile_t"))
def ctc_decode_device(emission, *, blank=0, tile_t=None):
    merged = _ctc_decode_pallas(emission, blank=blank, tile_t=tile_t)
    return _compact(merged)


def greedy_ctc_decode(emission, labels, blank=0, tile_t=None) -> str:
    """Full equivalent of GreedyCTCDecoder.forward (returns the transcript string)."""
    compact, count = ctc_decode_device(emission, blank=blank, tile_t=tile_t)
    jax.block_until_ready((compact, count))
    n = int(jax.device_get(count))
    idx_host = jax.device_get(compact[:n])   # only the short transcript leaves device
    # TODO(synk): label-table lookup / string join has no Pallas equivalent; host-side.
    return "".join(labels[int(i)] for i in idx_host)


def _reference_decode(emission, labels, blank=0):
    """Pure numpy/python reference mirroring the PyTorch module."""
    import numpy as np
    em = np.asarray(jax.device_get(emission))
    indices = np.argmax(em, axis=-1)
    dedup = [int(indices[0])]
    for t in range(1, len(indices)):
        if indices[t] != indices[t - 1]:
            dedup.append(int(indices[t]))
    dedup = [i for i in dedup if i != blank]
    return "".join(labels[i] for i in dedup)


if __name__ == "__main__":
    key = jax.random.PRNGKey(0)
    k1, k2 = jax.random.split(key)

    # 32 deterministic labels; index 0 is the CTC blank.
    labels = ["-"] + [chr(ord("a") + i) for i in range(26)] + ["|", "'", ".", ",", " "]
    num_label = len(labels)   # 32

    # Case 1: small single-tile shape matching the module convention [num_seq, num_label].
    em_small = jax.random.normal(k1, (8, num_label), dtype=jnp.float32)
    got = greedy_ctc_decode(em_small, labels, blank=0)
    want = _reference_decode(em_small, labels, blank=0)
    assert got == want, (got, want)

    # Case 2: multi-tile path (T=200, tile_t=64 -> 4 grid steps + tail padding), with
    # forced duplicate argmaxes straddling the 63|64 tile boundary and a forced blank.
    em_multi = jax.random.normal(k2, (200, num_label), dtype=jnp.float32)
    em_multi = em_multi.at[64].set(em_multi[63]).at[65].set(em_multi[63])
    em_multi = em_multi.at[10, 0].set(100.0)
    got = greedy_ctc_decode(em_multi, labels, blank=0, tile_t=64)
    want = _reference_decode(em_multi, labels, blank=0)
    assert got == want, (got, want)

    # Case 3: default (auto) tile selection on the same multi-tile input.
    got = greedy_ctc_decode(em_multi, labels, blank=0)
    assert got == want, (got, want)

    print("KERNEL_OK")
</pallas_src>

<mosaic_0001>
module attributes {stable_mosaic.version = 11 : i64} {
  func.func @_ctc_decode_kernel(%arg0: i32, %arg1: memref<8x32xf32, #tpu.memory_space<vmem>>, %arg2: memref<8x32xf32, #tpu.memory_space<vmem>>, %arg3: memref<8x1xi32, #tpu.memory_space<vmem>>) attributes {dimension_semantics = [#tpu.dimension_semantics<parallel>], iteration_bounds = array<i64: 1>, scalar_prefetch = 0 : i64, scratch_operands = 0 : i64, tpu.core_type = #tpu.core_type<tc>, window_params = [{transform_indices = @transform_0, window_bounds = array<i64: 8, 32>}, {transform_indices = @transform_1, window_bounds = array<i64: 8, 32>}, {transform_indices = @transform_2, window_bounds = array<i64: 8, 1>}]} {
    %c0 = arith.constant 0 : index
    %c0_0 = arith.constant 0 : index
    %0 = vector.load %arg1[%c0, %c0_0] : memref<8x32xf32, #tpu.memory_space<vmem>>, vector<8x32xf32>
    %cst = arith.constant dense<0xFF800000> : vector<8xf32>
    %1 = vector.multi_reduction <maximumf>, %0, %cst [1] : vector<8x32xf32> to vector<8xf32>
    %2 = vector.shape_cast %1 : vector<8xf32> to vector<8x1xf32>
    %3 = tpu.iota {dimensions = array<i32: 1>} : vector<8x32xi32>
    %4 = vector.broadcast %2 : vector<8x1xf32> to vector<8x32xf32>
    %5 = arith.cmpf oeq, %0, %4 : vector<8x32xf32>
    %c32_i32 = arith.constant 32 : i32
    %6 = vector.broadcast %c32_i32 : i32 to vector<8x32xi32>
    %7 = arith.select %5, %3, %6 : vector<8x32xi1>, vector<8x32xi32>
    %cst_1 = arith.constant dense<2147483647> : vector<8xi32>
    %8 = vector.multi_reduction <minsi>, %7, %cst_1 [1] : vector<8x32xi32> to vector<8xi32>
    %9 = vector.shape_cast %8 : vector<8xi32> to vector<8x1xi32>
    %c31_i32 = arith.constant 31 : i32
    %10 = vector.broadcast %c31_i32 : i32 to vector<8x1xi32>
    %11 = arith.minsi %9, %10 : vector<8x1xi32>
    %c1_i32 = arith.constant 1 : i32
    %12 = tpu.dynamic_rotate %11 by %c1_i32 dim 0 : vector<8x1xi32>, i32 -> vector<8x1xi32>
    %c0_2 = arith.constant 0 : index
    %c0_3 = arith.constant 0 : index
    %13 = vector.load %arg2[%c0_2, %c0_3] : memref<8x32xf32, #tpu.memory_space<vmem>>, vector<8x32xf32>
    %cst_4 = arith.constant dense<0xFF800000> : vector<8xf32>
    %14 = vector.multi_reduction <maximumf>, %13, %cst_4 [1] : vector<8x32xf32> to vector<8xf32>
    %15 = vector.shape_cast %14 : vector<8xf32> to vector<8x1xf32>
    %16 = tpu.iota {dimensions = array<i32: 1>} : vector<8x32xi32>
    %17 = vector.broadcast %15 : vector<8x1xf32> to vector<8x32xf32>
    %18 = arith.cmpf oeq, %13, %17 : vector<8x32xf32>
    %c32_i32_5 = arith.constant 32 : i32
    %19 = vector.broadcast %c32_i32_5 : i32 to vector<8x32xi32>
    %20 = arith.select %18, %16, %19 : vector<8x32xi1>, vector<8x32xi32>
    %cst_6 = arith.constant dense<2147483647> : vector<8xi32>
    %21 = vector.multi_reduction <minsi>, %20, %cst_6 [1] : vector<8x32xi32> to vector<8xi32>
    %22 = vector.shape_cast %21 : vector<8xi32> to vector<8x1xi32>
    %c31_i32_7 = arith.constant 31 : i32
    %23 = vector.broadcast %c31_i32_7 : i32 to vector<8x1xi32>
    %24 = arith.minsi %22, %23 : vector<8x1xi32>
    %25 = vector.extract_strided_slice %24 {offsets = [7, 0], sizes = [1, 1], strides = [1, 1]} : vector<8x1xi32> to vector<1x1xi32>
    %26 = tpu.iota {dimensions = array<i32: 0>} : vector<8x1xi32>
    %c0_i32 = arith.constant 0 : i32
    %27 = vector.broadcast %c0_i32 : i32 to vector<8x1xi32>
    %28 = arith.cmpi eq, %26, %27 : vector<8x1xi32>
    %29 = vector.shape_cast %25 : vector<1x1xi32> to vector<1x1xi32>
    %30 = vector.broadcast %29 : vector<1x1xi32> to vector<8x1xi32>
    %31 = arith.select %28, %30, %12 : vector<8x1xi1>, vector<8x1xi32>
    %c0_i32_8 = arith.constant 0 : i32
    %32 = arith.cmpi eq, %arg0, %c0_i32_8 : i32
    %c0_i32_9 = arith.constant 0 : i32
    %33 = vector.broadcast %c0_i32_9 : i32 to vector<8x1xi32>
    %34 = arith.cmpi eq, %26, %33 : vector<8x1xi32>
    %35 = vector.broadcast %32 : i1 to vector<8x1xi1>
    %36 = arith.andi %35, %34 : vector<8x1xi1>
    %c0_i32_10 = arith.constant 0 : i32
    %37 = vector.broadcast %c0_i32_10 : i32 to vector<8x1xi32>
    %38 = arith.cmpi ne, %11, %37 : vector<8x1xi32>
    %39 = arith.cmpi ne, %11, %31 : vector<8x1xi32>
    %40 = arith.ori %36, %39 : vector<8x1xi1>
    %41 = arith.andi %38, %40 : vector<8x1xi1>
    %c-1_i32 = arith.constant -1 : i32
    %42 = vector.broadcast %c-1_i32 : i32 to vector<8x1xi32>
    %43 = arith.select %41, %11, %42 : vector<8x1xi1>, vector<8x1xi32>
    %c0_11 = arith.constant 0 : index
    %c0_12 = arith.constant 0 : index
    %44 = vector.load %arg3[%c0_11, %c0_12] : memref<8x1xi32, #tpu.memory_space<vmem>>, vector<8x1xi32>
    tpu.vector_store %arg3[%c0_11, %c0_12], %43 {strides = array<i32>} : memref<8x1xi32, #tpu.memory_space<vmem>>, vector<8x1xi32>,
    return
  }
  func.func @transform_0(%arg0: i32) -> (i32, i32) {
    %c0_i32 = arith.constant 0 : i32
    %c0_i32_0 = arith.constant 0 : i32
    return %arg0, %c0_i32 : i32, i32
  }
  func.func @transform_1(%arg0: i32) -> (i32, i32) {
    %c1_i32 = arith.constant 1 : i32
    %0 = arith.muli %arg0, %c1_i32 : i32
    %c1_i32_0 = arith.constant 1 : i32
    %1 = arith.subi %0, %c1_i32_0 : i32
    %c0_i32 = arith.constant 0 : i32
    %2 = arith.maxsi %1, %c0_i32 : i32
    %c0_i32_1 = arith.constant 0 : i32
    %c0_i32_2 = arith.constant 0 : i32
    return %2, %c0_i32_1 : i32, i32
  }
  func.func @transform_2(%arg0: i32) -> (i32, i32) {
    %c0_i32 = arith.constant 0 : i32
    %c0_i32_0 = arith.constant 0 : i32
    return %arg0, %c0_i32 : i32, i32
  }
}

</mosaic_0001>

<bundles_post_ra>
// kernel: ctc_decode_device.1
= control target key start
LH: loop header
LB: loop body
LE: loop exit
PB: predicated region body
PF: predicated region fallthrough
CT: control target
= control target key end

     0   :  { %7 = vsyncpa [#allocation3], 0  ;;  %s219_s0 = inlined_call_operand.hbm [shape: f32[8,32], index: 0, kind: input, shape index: {}, may-alias: {0,1}]   ;;  %s220_s1 = inlined_call_operand.hbm [shape: f32[8,32], index: 1, kind: input, shape index: {}, may-alias: {0,1}]   ;;  %s221_s2 = inlined_call_operand.vmem [shape: s32[8,1], index: 2, kind: output, shape index: {}]  }
   0x1   :  { %8 = vsyncpa [#allocation5], 0  ;;  %s171_s9 = smov [#allocation2]   ;;  %s172_s11 = smov [#allocation4]  }
   0x2   :  { %s15_s10 = sshll.u32 %s171_s9, 4  ;;  %s30_s12 = sshll.u32 %s172_s11, 4  ;;  %s16_s10 = int_to_ptr.vmem [resolvable:$true] %s15_s10  ;;  %s31_s12 = int_to_ptr.vmem [resolvable:$true] %s30_s12 }
   0x3   :  { %s123_s15 = scalar_lea.hbm %s219_s0, 128 }
   0x4   :  { %p124_p0 = scmp.ne.s32.totalorder %s219_s0, %s123_s15  ;;  %p127_p1 = scmp.lt.u32.totalorder %s123_s15, %s219_s0 }
   0x6   :  { %p129_p2 = pnand %p127_p1, %p124_p0 }
   0x8   :  { %132 = shalt.err (!%p129_p2)
}
   0x9   :  { %s133_s20 = scalar_lea.vmem %s16_s10, 128  ;;  %p138_p4 = scmp.lt.s32.totalorder %s16_s10, %s16_s10 }
   0xa   :  { %p134_p3 = scmp.ne.s32.totalorder %s16_s10, %s133_s20  ;;  %p139_p5 = scmp.lt.s32.totalorder %s133_s20, %s133_s20 }
   0xc   :  { %p140_p6 = por %p139_p5, %p138_p4 }
   0xe   :  { %p141_p7 = pnand %p140_p6, %p134_p3 }
  0x10   :  { %144 = shalt.err (!%p141_p7)
}
  0x11   :  { %18 = dma.hbm_to_vmem [thread:$0]  %s219_s0, 128, %s16_s10, [#allocation3]  }
  0x12   :  { %s145_s25 = scalar_lea.hbm %s220_s1, 128 }
  0x13   :  { %p146_p8 = scmp.ne.s32.totalorder %s220_s1, %s145_s25  ;;  %p149_p9 = scmp.lt.u32.totalorder %s145_s25, %s220_s1 }
  0x15   :  { %p151_p10 = pnand %p149_p9, %p146_p8 }
  0x17   :  { %154 = shalt.err (!%p151_p10)
}
  0x18   :  { %s155_s30 = scalar_lea.vmem %s31_s12, 128  ;;  %p160_p12 = scmp.lt.s32.totalorder %s31_s12, %s31_s12 }
  0x19   :  { %p156_p11 = scmp.ne.s32.totalorder %s31_s12, %s155_s30  ;;  %p161_p13 = scmp.lt.s32.totalorder %s155_s30, %s155_s30 }
  0x1b   :  { %p162_p0 = por %p161_p13, %p160_p12 }
  0x1d   :  { %p163_p1 = pnand %p162_p0, %p156_p11 }
  0x1f   :  { %166 = shalt.err (!%p163_p1)
}
  0x20   :  { %33 = dma.hbm_to_vmem [thread:$0]  %s220_s1, 128, %s31_s12, [#allocation5]  }
  0x21   :  { %167 = dma.done.wait [#allocation3], 128  }
  0x22   :  { %168 = vsyncadd [#allocation3], 4294967168 }
  0x23   :  { %169 = dma.done.wait [#allocation5], 128  }
  0x24   :  { %170 = vsyncadd [#allocation5], 4294967168  ;;  %vm44_vm0 = vcmask 261120   ;;  %v43_v0 = vld [vmem:[#allocation2] sm:$0xff]  ;;  %v70_v1 = vld [vmem:[#allocation4] sm:$0xff]  ;;  %v48_v4 = vlaneseq  ;;  %vm111_vm10 = vcmask 7168  }
  0x25   :  { %v45_v2 = vsel %vm44_vm0, %v43_v0, -inf  ;;  %v71_v3 = vsel %vm44_vm0, %v70_v1, -inf }
  0x26   :  { %46 = vmax.xlane.f32.xlu0 %v45_v2  ;;  %v49_v5 = vand.u32 127, %v48_v4  ;;  %v94_v29 = vshrl.u32 %v48_v4, 7 }
  0x28   :  { %v98_v34 = vsub.s32 7, %v94_v29  ;;  %vm95_vm7 = vcmp.eq.s32.totalorder %v94_v29, 0 }
  0x2a   :  { %72 = vmax.xlane.f32.xlu0 %v71_v3 }
  0xb3   :  { %v47_v6 = vpop.xlane.xlu0 %46 }
  0xb4   :  { %vm50_vm1 = vcmp.eq.f32.partialorder %v43_v0, %v47_v6 }
  0xb5   :  { %v51_v7 = vsel %vm50_vm1, %v49_v5, 32 }
  0xb6   :  { %v52_v8 = vsel %vm44_vm0, %v51_v7, 2147483647 }
  0xb7   :  { %v73_v9 = vpop.xlane.xlu0 %72  ;;  %v54_v10 = vshra.s32 %v52_v8, 16  ;;  %v53_v16 = vand.u32 65535, %v52_v8 }
  0xb8   :  { %vm74_vm2 = vcmp.eq.f32.partialorder %v70_v1, %v73_v9 }
  0xb9   :  { %v75_v11 = vsel %vm74_vm2, %v49_v5, 32  ;;  %v56_v12 = vcvt.s32.f32 %v54_v10  ;;  %v55_v18 = vcvt.s32.f32 %v53_v16 }
  0xba   :  { %v76_v13 = vsel %vm44_vm0, %v75_v11, 2147483647 }
  0xbb   :  { %57 = vmin.xlane.f32.xlu1 %v56_v12  ;;  %v78_v14 = vshra.s32 %v76_v13, 16  ;;  %v77_v19 = vand.u32 65535, %v76_v13 }
  0xbd   :  { %v80_v15 = vcvt.s32.f32 %v78_v14  ;;  %v79_v22 = vcvt.s32.f32 %v77_v19 }
  0xbf   :  { %81 = vmin.xlane.f32.xlu1 %v80_v15 }
 0x148   :  { %v58_v17 = vpop.xlane.xlu1 %57 }
 0x149   :  { %vm59_vm3 = vcmp.eq.f32.partialorder %v56_v12, %v58_v17  ;;  %v64_v24 = vcvt.f32.s32 %v58_v17 }
 0x14a   :  { %v60_v20 = vsel %vm59_vm3, %v55_v18, inf }
 0x14b   :  { %61 = vmin.xlane.f32.xlu0 %v60_v20  ;;  %v65_v26 = vshll.u32 %v64_v24, 16 }
 0x14c   :  { %v82_v21 = vpop.xlane.xlu1 %81 }
 0x14d   :  { %vm83_vm4 = vcmp.eq.f32.partialorder %v80_v15, %v82_v21  ;;  %v88_v27 = vcvt.f32.s32 %v82_v21 }
 0x14e   :  { %v84_v23 = vsel %vm83_vm4, %v79_v22, inf }
 0x14f   :  { %85 = vmin.xlane.f32.xlu1 %v84_v23  ;;  %v89_v32 = vshll.u32 %v88_v27, 16 }
 0x1d8   :  { %v62_v25 = vpop.xlane.xlu0 %61 }
 0x1d9   :  { %v63_v28 = vcvt.f32.s32 %v62_v25 }
 0x1db   :  { %v66_v30 = vadd.s32 %v65_v26, %v63_v28 }
 0x1dc   :  { %v86_v31 = vpop.xlane.xlu1 %85 }
 0x1dd   :  { %vm67_vm5 = vcmp.lt.s32.totalorder %v66_v30, 31  ;;  %v87_v33 = vcvt.f32.s32 %v86_v31 }
 0x1de   :  { %v68_v36 = vsel %vm67_vm5, %v66_v30, 31 }
 0x1df   :  { %v90_v35 = vadd.s32 %v89_v32, %v87_v33  ;;  %v69_v38 = vrot.slane %v68_v36, 7  ;;  %vm106_vm9 = vcmp.ne.s32.totalorder %v68_v36, 0 }
 0x1e1   :  { %vm91_vm6 = vcmp.lt.s32.totalorder %v90_v35, 31 }
 0x1e2   :  { %v92_v37 = vsel %vm91_vm6, %v90_v35, 31 }
 0x1e3   :  { %v99_v39 = vrot.slane %v92_v37, %v98_v34 }
 0x1e5   :  { %v100_v40 = vsel %vm95_vm7, %v99_v39, %v69_v38 }
 0x1e6   :  { %vm107_vm8 = vcmp.ne.s32.totalorder %v68_v36, %v100_v40 }
 0x1e7   :  { %vm108_vm11 = vmor %vm95_vm7, %vm107_vm8 }
 0x1e8   :  { %vm109_vm12 = vmand %vm106_vm9, %vm108_vm11 }
 0x1e9   :  { %v110_v41 = vsel %vm109_vm12, %v68_v36, 4294967295 }
 0x1ea   :  { %112 = vst.msk [vmem:[%s221_s2] sm:$0xff] %vm111_vm10, %v110_v41 }
 0x1eb   :  { %117 = vsyncpa [#allocation3], 1 }
 0x1ec   :  { %118 = vsyncpa [#allocation5], 1 }

</bundles_post_ra>
